<compile_context>
chip_gen: v5e
topology: v5e:2x2
jax: 0.10.0
libtpu: 0.0.40
codegen_flags: <defaults>
</compile_context>

<pallas_src>
import jax
import jax.numpy as jnp
from jax.experimental import pallas as pl
from jax.experimental.pallas import tpu as pltpu

K_IN = 28 * 28          # 784
N_HID = 128
N_OUT = 10
N_OUT_PAD = 128         # fc2 output padded to a full lane width (lane-dense stores)
MAX_TILE_B = 1024       # double-buffered x tile at 1024 rows ~= 6 MiB VMEM -> fits everywhere


def mlp_kernel(x_ref, w1_ref, b1_ref, w2_ref, b2_ref, o_ref):
    # Cast x to bf16 in-register; HBM still only streams the original f32 once.
    x = x_ref[...].astype(jnp.bfloat16)
    # fc1: (tile_b, 784) @ (784, 128) on the MXU, f32 accumulation.
    h = jnp.dot(x, w1_ref[...], preferred_element_type=jnp.float32)
    h = jnp.maximum(h + b1_ref[...], 0.0)            # bias + ReLU in f32 on the VPU
    # fc2: (tile_b, 128) @ (128, 128) -> lane-dense (tile_b, 128) output.
    out = jnp.dot(h.astype(jnp.bfloat16), w2_ref[...],
                  preferred_element_type=jnp.float32)
    o_ref[...] = (out + b2_ref[...]).astype(o_ref.dtype)


def _pick_tile_b(batch):
    """Batch tile: aim for >=2 tiles (v7x megacore), cap at 1024, multiple of 8."""
    tile = ((pl.cdiv(batch, 2) + 7) // 8) * 8
    return max(8, min(MAX_TILE_B, tile))


@jax.jit
def net_forward(x, w1, b1, w2, b2):
    """Forward pass of Net. x: any shape with 784 trailing elements per example."""
    x2 = x.reshape(-1, K_IN)                       # PyTorch x.view(-1, 784); no pad/cast
    B = x2.shape[0]
    tile_b = _pick_tile_b(B)
    num_tiles = pl.cdiv(B, tile_b)                 # ragged last block -> masked stores

    # Resident operands (tiny, one-time host-side prep): bf16 weights, f32 biases.
    w1b = w1.astype(jnp.bfloat16)
    w2b = jnp.pad(w2, ((0, 0), (0, N_OUT_PAD - N_OUT))).astype(jnp.bfloat16)
    b1_2d = b1.reshape(1, N_HID).astype(jnp.float32)
    b2_2d = jnp.pad(b2, ((0, N_OUT_PAD - N_OUT),)).reshape(1, N_OUT_PAD).astype(jnp.float32)

    flops = 2 * B * K_IN * N_HID + 2 * B * N_HID * N_OUT_PAD
    bytes_accessed = (
        x2.size * 4                                  # f32 x streamed once
        + w1b.size * 2 + w2b.size * 2                # bf16 resident weights
        + b1_2d.size * 4 + b2_2d.size * 4            # f32 biases
        + B * N_OUT_PAD * 2                          # bf16 padded output writeback
    )

    out = pl.pallas_call(
        mlp_kernel,
        out_shape=jax.ShapeDtypeStruct((B, N_OUT_PAD), jnp.bfloat16),
        grid=(num_tiles,),
        in_specs=[
            # x tiles over the batch grid; last dim 784 equals the full array dim.
            pl.BlockSpec((tile_b, K_IN), lambda i: (i, 0)),
            # Weights / biases: constant block index -> VMEM-resident across tiles.
            pl.BlockSpec((K_IN, N_HID), lambda i: (0, 0)),
            pl.BlockSpec((1, N_HID), lambda i: (0, 0)),
            pl.BlockSpec((N_HID, N_OUT_PAD), lambda i: (0, 0)),
            pl.BlockSpec((1, N_OUT_PAD), lambda i: (0, 0)),
        ],
        out_specs=pl.BlockSpec((tile_b, N_OUT_PAD), lambda i: (i, 0)),
        compiler_params=pltpu.CompilerParams(
            dimension_semantics=("parallel",),       # shard batch tiles across TCs (v7x)
        ),
        cost_estimate=pl.CostEstimate(
            flops=flops, transcendentals=0, bytes_accessed=bytes_accessed),
    )(x2, w1b, b1_2d, w2b, b2_2d)

    # Real (B, 10) logits in f32 (tiny slice + cast; padded lanes dropped here).
    return out[:, :N_OUT].astype(jnp.float32)


def init_params(key):
    """Deterministic init mimicking nn.Linear (uniform +-1/sqrt(fan_in))."""
    k1, k2, k3, k4 = jax.random.split(key, 4)
    bound1 = 1.0 / jnp.sqrt(float(K_IN))
    bound2 = 1.0 / jnp.sqrt(float(N_HID))
    w1 = jax.random.uniform(k1, (K_IN, N_HID), jnp.float32, -bound1, bound1)
    b1 = jax.random.uniform(k2, (N_HID,), jnp.float32, -bound1, bound1)
    w2 = jax.random.uniform(k3, (N_HID, N_OUT), jnp.float32, -bound2, bound2)
    b2 = jax.random.uniform(k4, (N_OUT,), jnp.float32, -bound2, bound2)
    return w1, b1, w2, b2


if __name__ == "__main__":
    key = jax.random.PRNGKey(0)
    kx, kp = jax.random.split(key)

    # Small MNIST-like batch: (B, 1, 28, 28), NCHW as in PyTorch.
    B = 8
    x = jax.random.normal(kx, (B, 1, 28, 28), jnp.float32)
    w1, b1, w2, b2 = init_params(kp)

    out = net_forward(x, w1, b1, w2, b2)
    out = jax.block_until_ready(out)

    # Reference in plain f32 JAX. Kernel uses bf16 matmul operands / bf16 output
    # with f32 accumulation, so tolerance is loosened accordingly.
    x2 = x.reshape(-1, K_IN)
    ref = jnp.maximum(x2 @ w1 + b1, 0.0) @ w2 + b2
    assert out.shape == (B, N_OUT), out.shape
    assert jnp.allclose(out, ref, atol=5e-2, rtol=5e-2), (
        float(jnp.max(jnp.abs(out - ref))))

    print("KERNEL_OK")
</pallas_src>

<mosaic_0001>
module attributes {stable_mosaic.version = 11 : i64} {
  func.func @mlp_kernel(%arg0: i32, %arg1: memref<8x784xf32, #tpu.memory_space<vmem>>, %arg2: memref<784x128xbf16, #tpu.memory_space<vmem>>, %arg3: memref<1x128xf32, #tpu.memory_space<vmem>>, %arg4: memref<128x128xbf16, #tpu.memory_space<vmem>>, %arg5: memref<1x128xf32, #tpu.memory_space<vmem>>, %arg6: memref<8x128xbf16, #tpu.memory_space<vmem>>) attributes {dimension_semantics = [#tpu.dimension_semantics<parallel>], iteration_bounds = array<i64: 1>, scalar_prefetch = 0 : i64, scratch_operands = 0 : i64, tpu.core_type = #tpu.core_type<tc>, window_params = [{transform_indices = @transform_0, window_bounds = array<i64: 8, 784>}, {pipeline_mode = #tpu.pipeline_mode<synchronous>, transform_indices = @transform_1, window_bounds = array<i64: 784, 128>}, {pipeline_mode = #tpu.pipeline_mode<synchronous>, transform_indices = @transform_2, window_bounds = array<i64: 1, 128>}, {pipeline_mode = #tpu.pipeline_mode<synchronous>, transform_indices = @transform_3, window_bounds = array<i64: 128, 128>}, {pipeline_mode = #tpu.pipeline_mode<synchronous>, transform_indices = @transform_4, window_bounds = array<i64: 1, 128>}, {transform_indices = @transform_5, window_bounds = array<i64: 8, 128>}]} {
    %c0 = arith.constant 0 : index
    %c0_0 = arith.constant 0 : index
    %0 = vector.load %arg1[%c0, %c0_0] : memref<8x784xf32, #tpu.memory_space<vmem>>, vector<8x784xf32>
    %1 = arith.truncf %0 : vector<8x784xf32> to vector<8x784xbf16>
    %c0_1 = arith.constant 0 : index
    %c0_2 = arith.constant 0 : index
    %2 = vector.load %arg2[%c0_1, %c0_2] : memref<784x128xbf16, #tpu.memory_space<vmem>>, vector<784x128xbf16>
    %cst = arith.constant dense<0.000000e+00> : vector<8x128xf32>
    %3 = tpu.matmul %1, %2, %cst {dimension_numbers = #tpu.dot_dimension_numbers<[1], [0], [0], [1], [0, 0, 1, 1], [], []>} : vector<8x784xbf16>, vector<784x128xbf16>, vector<8x128xf32> -> vector<8x128xf32>
    %c0_3 = arith.constant 0 : index
    %c0_4 = arith.constant 0 : index
    %4 = vector.load %arg3[%c0_3, %c0_4] : memref<1x128xf32, #tpu.memory_space<vmem>>, vector<1x128xf32>
    %5 = vector.broadcast %4 : vector<1x128xf32> to vector<8x128xf32>
    %6 = arith.addf %3, %5 : vector<8x128xf32>
    %cst_5 = arith.constant 0.000000e+00 : f32
    %7 = vector.broadcast %cst_5 : f32 to vector<8x128xf32>
    %8 = arith.maximumf %6, %7 : vector<8x128xf32>
    %9 = arith.truncf %8 : vector<8x128xf32> to vector<8x128xbf16>
    %c0_6 = arith.constant 0 : index
    %c0_7 = arith.constant 0 : index
    %10 = vector.load %arg4[%c0_6, %c0_7] : memref<128x128xbf16, #tpu.memory_space<vmem>>, vector<128x128xbf16>
    %cst_8 = arith.constant dense<0.000000e+00> : vector<8x128xf32>
    %11 = tpu.matmul %9, %10, %cst_8 {dimension_numbers = #tpu.dot_dimension_numbers<[1], [0], [0], [1], [0, 0, 1, 1], [], []>} : vector<8x128xbf16>, vector<128x128xbf16>, vector<8x128xf32> -> vector<8x128xf32>
    %c0_9 = arith.constant 0 : index
    %c0_10 = arith.constant 0 : index
    %12 = vector.load %arg5[%c0_9, %c0_10] : memref<1x128xf32, #tpu.memory_space<vmem>>, vector<1x128xf32>
    %13 = vector.broadcast %12 : vector<1x128xf32> to vector<8x128xf32>
    %14 = arith.addf %11, %13 : vector<8x128xf32>
    %15 = arith.truncf %14 : vector<8x128xf32> to vector<8x128xbf16>
    %c0_11 = arith.constant 0 : index
    %c0_12 = arith.constant 0 : index
    %16 = vector.load %arg6[%c0_11, %c0_12] : memref<8x128xbf16, #tpu.memory_space<vmem>>, vector<8x128xbf16>
    tpu.vector_store %arg6[%c0_11, %c0_12], %15 {strides = array<i32>} : memref<8x128xbf16, #tpu.memory_space<vmem>>, vector<8x128xbf16>,
    return
  }
  func.func @transform_0(%arg0: i32) -> (i32, i32) {
    %c0_i32 = arith.constant 0 : i32
    %c0_i32_0 = arith.constant 0 : i32
    return %arg0, %c0_i32 : i32, i32
  }
  func.func @transform_1(%arg0: i32) -> (i32, i32) {
    %c0_i32 = arith.constant 0 : i32
    %c0_i32_0 = arith.constant 0 : i32
    %c0_i32_1 = arith.constant 0 : i32
    return %c0_i32, %c0_i32_0 : i32, i32
  }
  func.func @transform_2(%arg0: i32) -> (i32, i32) {
    %c0_i32 = arith.constant 0 : i32
    %c0_i32_0 = arith.constant 0 : i32
    %c0_i32_1 = arith.constant 0 : i32
    return %c0_i32, %c0_i32_0 : i32, i32
  }
  func.func @transform_3(%arg0: i32) -> (i32, i32) {
    %c0_i32 = arith.constant 0 : i32
    %c0_i32_0 = arith.constant 0 : i32
    %c0_i32_1 = arith.constant 0 : i32
    return %c0_i32, %c0_i32_0 : i32, i32
  }
  func.func @transform_4(%arg0: i32) -> (i32, i32) {
    %c0_i32 = arith.constant 0 : i32
    %c0_i32_0 = arith.constant 0 : i32
    %c0_i32_1 = arith.constant 0 : i32
    return %c0_i32, %c0_i32_0 : i32, i32
  }
  func.func @transform_5(%arg0: i32) -> (i32, i32) {
    %c0_i32 = arith.constant 0 : i32
    %c0_i32_0 = arith.constant 0 : i32
    return %arg0, %c0_i32 : i32, i32
  }
}

</mosaic_0001>

<bundles_post_ra>
// kernel: net_forward.1
= control target key start
LH: loop header
LB: loop body
LE: loop exit
PB: predicated region body
PF: predicated region fallthrough
CT: control target
= control target key end

     0   :  { %vm431_vm0 = vcmask 130048   ;;  %s1134_s1 = inlined_call_operand.vmem [shape: bf16[784,128], index: 1, kind: input, shape index: {}]   ;;  %s1135_s2 = inlined_call_operand.vmem [shape: f32[1,128], index: 2, kind: input, shape index: {}]   ;;  %s1136_s0 = inlined_call_operand.vmem [shape: f32[8,784], index: 0, kind: input, shape index: {}]   ;;  %s1137_s4 = inlined_call_operand.vmem [shape: f32[1,128], index: 4, kind: input, shape index: {}]   ;;  %s1138_s3 = inlined_call_operand.vmem [shape: bf16[128,128], index: 3, kind: input, shape index: {}]   ;;  %s1139_s5 = inlined_call_operand.vmem [shape: bf16[8,128], index: 5, kind: output, shape index: {}]  }
   0x1   :  { %v851_v0 = vld [vmem:[%s1134_s1 + $0x38] sm:$0xff]  ;;  %v850_v3 = vld [vmem:[%s1134_s1 + $0x30] sm:$0xff]  ;;  %v849_v8 = vld [vmem:[%s1134_s1 + $0x28] sm:$0xff] }
   0x2   :  { %v859_v1 = vld [vmem:[%s1134_s1 + $0x78] sm:$0xff]  ;;  %435 = vmatpush.bf16.msra.mxu0 %v851_v0  ;;  %v858_v4 = vld [vmem:[%s1134_s1 + $0x70] sm:$0xff]  ;;  %v857_v9 = vld [vmem:[%s1134_s1 + $0x68] sm:$0xff] }
   0x3   :  { %v867_v2 = vld [vmem:[%s1134_s1 + $0xb8] sm:$0xff]  ;;  %448 = vmatpush.bf16.msra.mxu1 %v859_v1  ;;  %v866_v5 = vld [vmem:[%s1134_s1 + $0xb0] sm:$0xff]  ;;  %v865_v10 = vld [vmem:[%s1134_s1 + $0xa8] sm:$0xff] }
   0x4   :  { %461 = vmatpush.bf16.msra.mxu2 %v867_v2  ;;  %v875_v6 = vld [vmem:[%s1134_s1 + $0xf8] sm:$0xff]  ;;  %v874_v7 = vld [vmem:[%s1134_s1 + $0xf0] sm:$0xff]  ;;  %v873_v11 = vld [vmem:[%s1134_s1 + $0xe8] sm:$0xff] }
   0x5   :  { %474 = vmatpush.bf16.msra.mxu3 %v875_v6  ;;  %v848_v12 = vld [vmem:[%s1134_s1 + $0x20] sm:$0xff]  ;;  %v847_v16 = vld [vmem:[%s1134_s1 + $0x18] sm:$0xff]  ;;  %v846_v20 = vld [vmem:[%s1134_s1 + $0x10] sm:$0xff] }
   0x6   :  { %436 = vmatpush.bf16.msra.mxu0 %v850_v3  ;;  %v856_v13 = vld [vmem:[%s1134_s1 + $0x60] sm:$0xff]  ;;  %v855_v17 = vld [vmem:[%s1134_s1 + $0x58] sm:$0xff]  ;;  %v854_v21 = vld [vmem:[%s1134_s1 + $0x50] sm:$0xff] }
   0x7   :  { %449 = vmatpush.bf16.msra.mxu1 %v858_v4  ;;  %v864_v14 = vld [vmem:[%s1134_s1 + $0xa0] sm:$0xff]  ;;  %v863_v18 = vld [vmem:[%s1134_s1 + $0x98] sm:$0xff]  ;;  %v862_v22 = vld [vmem:[%s1134_s1 + $0x90] sm:$0xff] }
   0x8   :  { %462 = vmatpush.bf16.msra.mxu2 %v866_v5  ;;  %v872_v15 = vld [vmem:[%s1134_s1 + $0xe0] sm:$0xff]  ;;  %v871_v19 = vld [vmem:[%s1134_s1 + $0xd8] sm:$0xff]  ;;  %v870_v23 = vld [vmem:[%s1134_s1 + $0xd0] sm:$0xff] }
   0x9   :  { %475 = vmatpush.bf16.msra.mxu3 %v874_v7  ;;  %v845_v24 = vld [vmem:[%s1134_s1 + $0x8] sm:$0xff]  ;;  %v844_v27 = vld [vmem:[%s1134_s1] sm:$0xff]  ;;  %v883_v32 = vld [vmem:[%s1134_s1 + $0x138] sm:$0xff] }
   0xa   :  { %437 = vmatpush.bf16.msra.mxu0 %v849_v8  ;;  %v853_v25 = vld [vmem:[%s1134_s1 + $0x48] sm:$0xff]  ;;  %v852_v29 = vld [vmem:[%s1134_s1 + $0x40] sm:$0xff]  ;;  %v891_v33 = vld [vmem:[%s1134_s1 + $0x178] sm:$0xff] }
   0xb   :  { %450 = vmatpush.bf16.msra.mxu1 %v857_v9  ;;  %v861_v26 = vld [vmem:[%s1134_s1 + $0x88] sm:$0xff]  ;;  %v21_v30 = vld [vmem:[%s1136_s0] sm:$0xff]  ;;  %v23_v35 = vld [vmem:[%s1136_s0 + $0x10] sm:$0xff] }
   0xc   :  { %463 = vmatpush.bf16.msra.mxu2 %v865_v10  ;;  %v869_v28 = vld [vmem:[%s1134_s1 + $0xc8] sm:$0xff]  ;;  %v860_v34 = vld [vmem:[%s1134_s1 + $0x80] sm:$0xff]  ;;  %v28_v36 = vpack.c.bf16 %v21_v30, %v21_v30  ;;  %v24_v40 = vld [vmem:[%s1136_s0 + $0x18] sm:$0xff]  ;;  %v30_v43 = vpack.c.bf16 %v23_v35, %v23_v35 }
   0xd   :  { %476 = vmatpush.bf16.msra.mxu3 %v873_v11  ;;  %v22_v31 = vld [vmem:[%s1136_s0 + $0x8] sm:$0xff]  ;;  %v868_v38 = vld [vmem:[%s1134_s1 + $0xc0] sm:$0xff]  ;;  %v882_v41 = vld [vmem:[%s1134_s1 + $0x130] sm:$0xff]  ;;  %v31_v44 = vpack.c.bf16 %v24_v40, %v24_v40 }
   0xe   :  { %438 = vmatpush.bf16.msra.mxu0 %v848_v12  ;;  %v29_v37 = vpack.c.bf16 %v22_v31, %v22_v31  ;;  %v892_v39 = vld [vmem:[%s1134_s1 + $0x180] sm:$0xff]  ;;  %v890_v42 = vld [vmem:[%s1134_s1 + $0x170] sm:$0xff]  ;;  %v881_v45 = vld [vmem:[%s1134_s1 + $0x128] sm:$0xff] }
   0xf   :  { %451 = vmatpush.bf16.msra.mxu1 %v856_v13  ;;  %v889_v46 = vld [vmem:[%s1134_s1 + $0x168] sm:$0xff]  ;;  %v880_v47 = vld [vmem:[%s1134_s1 + $0x120] sm:$0xff]  ;;  %v879_v49 = vld [vmem:[%s1134_s1 + $0x118] sm:$0xff] }
  0x10   :  { %464 = vmatpush.bf16.msra.mxu2 %v864_v14  ;;  %v888_v48 = vld [vmem:[%s1134_s1 + $0x160] sm:$0xff]  ;;  %v887_v50 = vld [vmem:[%s1134_s1 + $0x158] sm:$0xff]  ;;  %v27_v51 = vld [vmem:[%s1136_s0 + $0x30] sm:$0xff] }
  0x11   :  { %477 = vmatpush.bf16.msra.mxu3 %v872_v15  ;;  %v878_v52 = vld [vmem:[%s1134_s1 + $0x110] sm:$0xff]  ;;  %v34_v54 = vpack.c.bf16 %v27_v51, %v27_v51  ;;  %v877_v55 = vld [vmem:[%s1134_s1 + $0x108] sm:$0xff]  ;;  %v876_v57 = vld [vmem:[%s1134_s1 + $0x100] sm:$0xff] }
  0x12   :  { %439 = vmatpush.bf16.msra.mxu0 %v847_v16  ;;  %v886_v53 = vld [vmem:[%s1134_s1 + $0x150] sm:$0xff]  ;;  %v885_v56 = vld [vmem:[%s1134_s1 + $0x148] sm:$0xff]  ;;  %v884_v58 = vld [vmem:[%s1134_s1 + $0x140] sm:$0xff] }
  0x13   :  { %452 = vmatpush.bf16.msra.mxu1 %v855_v17  ;;  %v25_v59 = vld [vmem:[%s1136_s0 + $0x20] sm:$0xff]  ;;  %v26_v60 = vld [vmem:[%s1136_s0 + $0x28] sm:$0xff]  ;;  %v900_v63 = vld [vmem:[%s1138_s3 + $0x38] sm:$0xff] }
  0x14   :  { %465 = vmatpush.bf16.msra.mxu2 %v863_v18  ;;  %v32_v61 = vpack.c.bf16 %v25_v59, %v25_v59  ;;  %v33_v62 = vpack.c.bf16 %v26_v60, %v26_v60  ;;  %v899_v0 = vld [vmem:[%s1138_s3 + $0x30] sm:$0xff]  ;;  %v898_v1 = vld [vmem:[%s1138_s3 + $0x28] sm:$0xff]  ;;  %v897_v2 = vld [vmem:[%s1138_s3 + $0x20] sm:$0xff] }
  0x15   :  { %478 = vmatpush.bf16.msra.mxu3 %v871_v19  ;;  %v896_v3 = vld [vmem:[%s1138_s3 + $0x18] sm:$0xff]  ;;  %v895_v4 = vld [vmem:[%s1138_s3 + $0x10] sm:$0xff]  ;;  %v894_v5 = vld [vmem:[%s1138_s3 + $0x8] sm:$0xff] }
  0x16   :  { %440 = vmatpush.bf16.msra.mxu0 %v846_v20  ;;  %v893_v8 = vld [vmem:[%s1138_s3] sm:$0xff] }
  0x17   :  { %453 = vmatpush.bf16.msra.mxu1 %v854_v21  ;;  %v901_v13 = vld [vmem:[%s1135_s2] ss:$0 sm:$0xff] }
  0x18   :  { %466 = vmatpush.bf16.msra.mxu2 %v862_v22  ;;  %v902_v31 = vld [vmem:[%s1137_s4] ss:$0 sm:$0xff] }
  0x19   :  { %479 = vmatpush.bf16.msra.mxu3 %v870_v23 }
  0x1a   :  { %441 = vmatpush.bf16.msra.mxu0 %v845_v24 }
  0x1b   :  { %454 = vmatpush.bf16.msra.mxu1 %v853_v25 }
  0x1c   :  { %467 = vmatpush.bf16.msra.mxu2 %v861_v26 }
  0x1d   :  { %480 = vmatpush.bf16.msra.mxu3 %v869_v28 }
  0x1e   :  { %442 = vmatpush.bf16.msra.mxu0 %v844_v27 }
  0x1f   :  { %455 = vmatpush.bf16.msra.mxu1 %v852_v29 }
  0x20   :  { %468 = vmatpush.bf16.msra.mxu2 %v860_v34 }
  0x21   :  { %443 = vmatmul.bf16.vlgmr.msra.gmra.mxu0 %v28_v36  ;;  %481 = vmatpush.bf16.msra.mxu3 %v868_v38 }
  0x22   :  { %487 = vmatpush.bf16.msrb.mxu0 %v883_v32  ;;  %456 = vmatmul.bf16.vlgmr.msra.gmra.mxu1 %v29_v37 }
  0x23   :  { %500 = vmatpush.bf16.msrb.mxu1 %v891_v33  ;;  %469 = vmatmul.bf16.vlgmr.msra.gmra.mxu2 %v30_v43 }
  0x24   :  { %520 = vmatpush.bf16.msrb.mxu2 %v892_v39  ;;  %482 = vmatmul.bf16.vlgmr.msra.gmra.mxu3 %v31_v44 }
  0x25   :  { %596 = vmatpush.bf16.msrb.mxu3 %v900_v63 }
  0x26   :  { %488 = vmatpush.bf16.msrb.mxu0 %v882_v41 }
  0x27   :  { %501 = vmatpush.bf16.msrb.mxu1 %v890_v42 }
  0x29   :  { %597 = vmatpush.bf16.msrb.mxu3 %v899_v0 }
  0x2a   :  { %489 = vmatpush.bf16.msrb.mxu0 %v881_v45 }
  0x2b   :  { %502 = vmatpush.bf16.msrb.mxu1 %v889_v46 }
  0x2d   :  { %598 = vmatpush.bf16.msrb.mxu3 %v898_v1 }
  0x2e   :  { %490 = vmatpush.bf16.msrb.mxu0 %v880_v47 }
  0x2f   :  { %503 = vmatpush.bf16.msrb.mxu1 %v888_v48 }
  0x31   :  { %599 = vmatpush.bf16.msrb.mxu3 %v897_v2 }
  0x32   :  { %491 = vmatpush.bf16.msrb.mxu0 %v879_v49 }
  0x33   :  { %504 = vmatpush.bf16.msrb.mxu1 %v887_v50  ;;  %811 = vmatmul.msk.bf16.vlgmr.msrb.gmra.mxu2 %vm431_vm0, %v34_v54 }
  0x35   :  { %600 = vmatpush.bf16.msrb.mxu3 %v896_v3 }
  0x36   :  { %492 = vmatpush.bf16.msrb.mxu0 %v878_v52 }
  0x37   :  { %505 = vmatpush.bf16.msrb.mxu1 %v886_v53 }
  0x39   :  { %601 = vmatpush.bf16.msrb.mxu3 %v895_v4 }
  0x3a   :  { %493 = vmatpush.bf16.msrb.mxu0 %v877_v55 }
  0x3b   :  { %506 = vmatpush.bf16.msrb.mxu1 %v885_v56 }
  0x3d   :  { %602 = vmatpush.bf16.msrb.mxu3 %v894_v5 }
  0x3e   :  { %494 = vmatpush.bf16.msrb.mxu0 %v876_v57 }
  0x3f   :  { %507 = vmatpush.bf16.msrb.mxu1 %v884_v58 }
  0x41   :  { %495 = vmatmul.bf16.vlgmr.msrb.gmra.mxu0 %v32_v61  ;;  %603 = vmatpush.bf16.msrb.mxu3 %v893_v8 }
  0x42   :  { %508 = vmatmul.bf16.vlgmr.msrb.gmra.mxu1 %v33_v62 }
  0x9e   :  { %v444_v6 = vpop.f32.mrf.mxu0 }
  0x9f   :  { %v457_v7 = vpop.f32.mrf.mxu1  ;;  %v445_v14 = vadd.f32 %v901_v13, %v444_v6 }
  0xa1   :  { %v458_v17 = vadd.f32 %v457_v7, %v445_v14 }
  0xa6   :  { %v446_v9 = vpop.f32.mrf.mxu0  ;;  %v470_v11 = vpop.f32.mrf.mxu2 }
  0xa7   :  { %v459_v10 = vpop.f32.mrf.mxu1  ;;  %v483_v12 = vpop.f32.mrf.mxu3  ;;  %v471_v18 = vadd.f32 %v470_v11, %v458_v17 }
  0xa9   :  { %v484_v20 = vadd.f32 %v483_v12, %v471_v18 }
  0xae   :  { %v472_v15 = vpop.f32.mrf.mxu2 }
  0xaf   :  { %v485_v16 = vpop.f32.mrf.mxu3 }
  0xb6   :  { %v522_v19 = vpop.f32.mrf.mxu2 }
  0xbe   :  { %v496_v21 = vpop.f32.mrf.mxu0  ;;  %v524_v25 = vpop.f32.mrf.mxu2 }
  0xbf   :  { %v509_v22 = vpop.f32.mrf.mxu1  ;;  %v497_v23 = vadd.f32 %v496_v21, %v484_v20 }
  0xc1   :  { %v510_v24 = vadd.f32 %v509_v22, %v497_v23 }
  0xc3   :  { %v523_v26 = vadd.f32 %v522_v19, %v510_v24 }
  0xc5   :  { %v526_v27 = vmax.f32 %v523_v26, 0.0 }
  0xc6   :  { %v498_v28 = vpop.f32.mrf.mxu0 }
  0xc7   :  { %v511_v29 = vpop.f32.mrf.mxu1  ;;  %v527_v30 = vpack.c.bf16 %v526_v27, %v526_v27 }
  0xc9   :  { %604 = vmatmul.bf16.vlgmr.msrb.gmra.mxu3 %v527_v30 }
 0x14c   :  { %v605_v32 = vpop.f32.mrf.mxu3 }
 0x14d   :  { %v606_v33 = vadd.f32 %v902_v31, %v605_v32 }
 0x14f   :  { %v609_v34 = vpack.c.bf16 %v606_v33, %v606_v33 }
 0x151   :  { %610 = vst [vmem:[%s1139_s5] sm:$0xf] %v609_v34 }
 0x154   :  { %v607_v35 = vpop.f32.mrf.mxu3 }

</bundles_post_ra>
